<compile_context>
chip_gen: v7x
topology: tpu7x:2x2x1
jax: 0.10.0
libtpu: 0.0.40
codegen_flags: <defaults>
</compile_context>

<pallas_src>
import functools

import numpy as np

import jax
import jax.numpy as jnp
from jax.experimental import pallas as pl
from jax.experimental.pallas import tpu as pltpu


def _round_up(x: int, m: int) -> int:
    return ((x + m - 1) // m) * m


def _vcdn_kernel(x_ref, selT_ref, w1T_ref, b1_ref, w2T_ref, b2_ref, o_ref,
                 *, negative_slope: float):
    """Fused VCDN forward for one batch tile (batch on lanes).

    x_ref:    (M*C, TB)  stacked, pre-sigmoid modality logits (row m*C+c = modality m, class c)
    selT_ref: (P, M*C)   static 0/1 Kronecker-expansion matrix, P = C**M
    w1T_ref:  (H, P)     b1_ref: (H, 1)
    w2T_ref:  (C, H)     b2_ref: (C, 1)
    o_ref:    (C, TB)
    """
    # log(sigmoid(x)): EUP ops over a (M*C, TB) slab -> full 128-lane utilization.
    ls = jnp.log(jax.nn.sigmoid(x_ref[...].astype(jnp.float32)))            # (M*C, TB)

    # Collapsed Kronecker expansion: single K=M*C MXU push instead of M pushes
    # plus (M-1) VPU products over the (P, TB) intermediate.
    featT = jnp.exp(jnp.dot(selT_ref[...], ls,
                            preferred_element_type=jnp.float32))            # (P, TB)

    # Hidden layer: h^T = W1^T @ feat^T + b1   (N = TB lanes on the MXU).
    hT = jnp.dot(w1T_ref[...], featT, preferred_element_type=jnp.float32)
    hT = hT + b1_ref[...]
    hT = jnp.where(hT > 0, hT, negative_slope * hT)                          # LeakyReLU(0.25)

    # Output layer: out^T = W2^T @ h^T + b2.
    outT = jnp.dot(w2T_ref[...], hT, preferred_element_type=jnp.float32)
    outT = outT + b2_ref[...]
    o_ref[...] = outT.astype(o_ref.dtype)                                    # unmasked lane-dense stores


def vcdn_forward(multimodal_input, w1, b1, w2, b2,
                 *, negative_slope: float = 0.25, tb: int | None = None):
    """VCDN forward pass.

    multimodal_input: list of M arrays, each [B, num_classes]
    w1: [num_classes**M, hidden_dim]   b1: [hidden_dim]
    w2: [hidden_dim, num_classes]      b2: [num_classes]
    returns: [B, num_classes]
    """
    num_modalities = len(multimodal_input)
    batch, num_classes = multimodal_input[0].shape
    pow_cls = num_classes ** num_modalities
    hidden = w1.shape[1]
    assert w1.shape[0] == pow_cls and w2.shape == (hidden, num_classes)
    dtype = multimodal_input[0].dtype
    mc = num_modalities * num_classes

    # ---- lane-dense layout: batch is the LAST (lane) axis everywhere ----
    # (M*C, B): row m*C + c holds modality m's logit for class c.
    x_t = jnp.concatenate([t.T for t in multimodal_input], axis=0)          # (M*C, B)

    # selT[f, m*C + c] = 1 iff the m-th (most-significant-first, matching torch's flatten
    # order i0*C^(M-1)+...+i_{M-1}) base-C digit of flat index f equals c.  Then
    #   feat^T = exp( selT @ log(sigmoid(x))^T ).
    flat_idx = np.arange(pow_cls)
    selT_np = np.zeros((pow_cls, mc), dtype=np.float32)
    for m in range(num_modalities):
        stride = num_classes ** (num_modalities - 1 - m)
        digit = (flat_idx // stride) % num_classes
        selT_np[flat_idx, m * num_classes + digit] = 1.0
    selT = jnp.asarray(selT_np)

    # Transposed weights / column biases (tiny one-off XLA ops, hoisted out of the kernel).
    w1T = jnp.asarray(w1).T                      # (H, P)
    w2T = jnp.asarray(w2).T                      # (C, H)
    b1c = jnp.asarray(b1).reshape(hidden, 1)
    b2c = jnp.asarray(b2).reshape(num_classes, 1)

    # ---- batch tiling: multiples of 128 lanes ----
    if tb is None:
        if batch <= 256:
            # One grid step: per-step overhead (~0.35us) would otherwise dominate on the
            # single-TensorCore v5e/v6e.
            tb = _round_up(max(batch, 1), 128)
        else:
            # >=2 tiles (so v7x's two TensorCores both get work), each <=512 lanes,
            # sized to minimize pad waste.
            n_steps = max(2, pl.cdiv(batch, 512))
            tb = _round_up(pl.cdiv(batch, n_steps), 128)
    else:
        tb = _round_up(tb, 128)
    b_pad = _round_up(batch, tb)
    if b_pad != batch:
        # Padded columns hold logits 0 -> sigmoid 0.5; harmless, sliced off below.
        x_t = jnp.pad(x_t, ((0, 0), (0, b_pad - batch)))

    kernel = functools.partial(_vcdn_kernel, negative_slope=negative_slope)

    itemsize = jnp.dtype(dtype).itemsize
    w_itemsize = jnp.dtype(w1.dtype).itemsize
    cost = pl.CostEstimate(
        flops=2 * b_pad * (pow_cls * mc + pow_cls * hidden + hidden * num_classes),
        transcendentals=b_pad * (2 * mc + pow_cls),
        bytes_accessed=int(x_t.size * itemsize + selT.size * 4
                           + (w1.size + b1.size + w2.size + b2.size) * w_itemsize
                           + num_classes * b_pad * itemsize),
    )

    out_t = pl.pallas_call(
        kernel,
        out_shape=jax.ShapeDtypeStruct((num_classes, b_pad), dtype),
        grid_spec=pltpu.PrefetchScalarGridSpec(
            num_scalar_prefetch=0,
            grid=(b_pad // tb,),
            in_specs=[
                # Stacked modality logits: tiled over batch (lanes).
                pl.BlockSpec((mc, tb), lambda i: (0, i)),
                # Selection matrix + MLP weights: whole-array, VMEM-resident across the grid
                # (constant index_map -> no per-step re-DMA).
                pl.BlockSpec((pow_cls, mc), lambda i: (0, 0)),
                pl.BlockSpec((hidden, pow_cls), lambda i: (0, 0)),
                pl.BlockSpec((hidden, 1), lambda i: (0, 0)),
                pl.BlockSpec((num_classes, hidden), lambda i: (0, 0)),
                pl.BlockSpec((num_classes, 1), lambda i: (0, 0)),
            ],
            out_specs=pl.BlockSpec((num_classes, tb), lambda i: (0, i)),
        ),
        compiler_params=pltpu.CompilerParams(
            dimension_semantics=("parallel",)),
        cost_estimate=cost,
    )(x_t, selT, w1T, b1c, w2T, b2c)

    # (C, b_pad) -> (B, C): tiny wrapper-side transpose + slice.
    return out_t.T[:batch]


def _reference(multimodal_input, w1, b1, w2, b2, negative_slope=0.25):
    """Pure-JAX mirror of the PyTorch VCDN.forward."""
    num_modalities = len(multimodal_input)
    s = [jax.nn.sigmoid(t) for t in multimodal_input]
    batch, num_classes = s[0].shape
    x = jnp.matmul(s[0][:, :, None], s[1][:, None, :]).reshape(
        batch, num_classes ** 2, 1)
    for m in range(2, num_modalities):
        x = jnp.matmul(x, s[m][:, None, :]).reshape(
            batch, num_classes ** (m + 1), 1)
    feat = x.reshape(batch, num_classes ** num_modalities)
    h = feat @ w1 + b1
    h = jnp.where(h > 0, h, negative_slope * h)
    return h @ w2 + b2


if __name__ == "__main__":
    num_modalities = 3
    num_classes = 4
    hidden_dim = 32
    batch = 8
    pow_cls = num_classes ** num_modalities   # 64

    key = jax.random.PRNGKey(0)
    keys = jax.random.split(key, num_modalities + 4)

    # Per-modality pre-softmax/logit predictions, [batch, num_classes].
    inputs = [jax.random.normal(keys[m], (batch, num_classes), dtype=jnp.float32)
              for m in range(num_modalities)]

    # 2-layer MLP head (Xavier-style weights; small random biases exercise the bias path —
    # reset_parameters() details are init-only).
    w1 = jax.random.normal(keys[-4], (pow_cls, hidden_dim), dtype=jnp.float32) \
        * jnp.sqrt(2.0 / (pow_cls + hidden_dim))
    b1 = 0.01 * jax.random.normal(keys[-3], (hidden_dim,), dtype=jnp.float32)
    w2 = jax.random.normal(keys[-2], (hidden_dim, num_classes), dtype=jnp.float32) \
        * jnp.sqrt(2.0 / (hidden_dim + num_classes))
    b2 = 0.01 * jax.random.normal(keys[-1], (num_classes,), dtype=jnp.float32)

    out = vcdn_forward(inputs, w1, b1, w2, b2)
    out = jax.block_until_ready(out)

    ref = _reference(inputs, w1, b1, w2, b2)
    assert out.shape == (batch, num_classes)
    # f32 with MXU accumulation order + exp(sum(log)) expansion: a few ulps looser than
    # the pure-XLA reference, well within 1e-4.
    assert jnp.allclose(out, ref, atol=1e-4, rtol=1e-4), (out, ref)

    print("KERNEL_OK")
</pallas_src>

<mosaic_0001>
module attributes {stable_mosaic.version = 11 : i64} {
  func.func @_vcdn_kernel(%arg0: i32, %arg1: memref<12x128xf32, #tpu.memory_space<vmem>>, %arg2: memref<64x12xf32, #tpu.memory_space<vmem>>, %arg3: memref<32x64xf32, #tpu.memory_space<vmem>>, %arg4: memref<32x1xf32, #tpu.memory_space<vmem>>, %arg5: memref<4x32xf32, #tpu.memory_space<vmem>>, %arg6: memref<4x1xf32, #tpu.memory_space<vmem>>, %arg7: memref<4x128xf32, #tpu.memory_space<vmem>>) attributes {dimension_semantics = [#tpu.dimension_semantics<parallel>], iteration_bounds = array<i64: 1>, scalar_prefetch = 0 : i64, scratch_operands = 0 : i64, tpu.core_type = #tpu.core_type<tc>, window_params = [{transform_indices = @transform_0, window_bounds = array<i64: 12, 128>}, {pipeline_mode = #tpu.pipeline_mode<synchronous>, transform_indices = @transform_1, window_bounds = array<i64: 64, 12>}, {pipeline_mode = #tpu.pipeline_mode<synchronous>, transform_indices = @transform_2, window_bounds = array<i64: 32, 64>}, {pipeline_mode = #tpu.pipeline_mode<synchronous>, transform_indices = @transform_3, window_bounds = array<i64: 32, 1>}, {pipeline_mode = #tpu.pipeline_mode<synchronous>, transform_indices = @transform_4, window_bounds = array<i64: 4, 32>}, {pipeline_mode = #tpu.pipeline_mode<synchronous>, transform_indices = @transform_5, window_bounds = array<i64: 4, 1>}, {transform_indices = @transform_6, window_bounds = array<i64: 4, 128>}]} {
    %c0 = arith.constant 0 : index
    %c0_0 = arith.constant 0 : index
    %0 = vector.load %arg1[%c0, %c0_0] : memref<12x128xf32, #tpu.memory_space<vmem>>, vector<12x128xf32>
    %1 = arith.negf %0 : vector<12x128xf32>
    %2 = math.exp %1 : vector<12x128xf32>
    %cst = arith.constant 1.000000e+00 : f32
    %3 = vector.broadcast %cst : f32 to vector<12x128xf32>
    %4 = arith.addf %3, %2 : vector<12x128xf32>
    %5 = arith.divf %3, %4 : vector<12x128xf32>
    %6 = math.log %5 : vector<12x128xf32>
    %c0_1 = arith.constant 0 : index
    %c0_2 = arith.constant 0 : index
    %7 = vector.load %arg2[%c0_1, %c0_2] : memref<64x12xf32, #tpu.memory_space<vmem>>, vector<64x12xf32>
    %cst_3 = arith.constant dense<0.000000e+00> : vector<64x128xf32>
    %8 = tpu.matmul %7, %6, %cst_3 {dimension_numbers = #tpu.dot_dimension_numbers<[1], [0], [0], [1], [0, 0, 1, 1], [], []>} : vector<64x12xf32>, vector<12x128xf32>, vector<64x128xf32> -> vector<64x128xf32>
    %9 = math.exp %8 : vector<64x128xf32>
    %c0_4 = arith.constant 0 : index
    %c0_5 = arith.constant 0 : index
    %10 = vector.load %arg3[%c0_4, %c0_5] : memref<32x64xf32, #tpu.memory_space<vmem>>, vector<32x64xf32>
    %cst_6 = arith.constant dense<0.000000e+00> : vector<32x128xf32>
    %11 = tpu.matmul %10, %9, %cst_6 {dimension_numbers = #tpu.dot_dimension_numbers<[1], [0], [0], [1], [0, 0, 1, 1], [], []>} : vector<32x64xf32>, vector<64x128xf32>, vector<32x128xf32> -> vector<32x128xf32>
    %c0_7 = arith.constant 0 : index
    %c0_8 = arith.constant 0 : index
    %12 = vector.load %arg4[%c0_7, %c0_8] : memref<32x1xf32, #tpu.memory_space<vmem>>, vector<32x1xf32>
    %13 = vector.broadcast %12 : vector<32x1xf32> to vector<32x128xf32>
    %14 = arith.addf %11, %13 : vector<32x128xf32>
    %cst_9 = arith.constant 0.000000e+00 : f32
    %15 = vector.broadcast %cst_9 : f32 to vector<32x128xf32>
    %16 = arith.cmpf ogt, %14, %15 : vector<32x128xf32>
    %cst_10 = arith.constant 2.500000e-01 : f32
    %17 = vector.broadcast %cst_10 : f32 to vector<32x128xf32>
    %18 = arith.mulf %17, %14 : vector<32x128xf32>
    %19 = arith.select %16, %14, %18 : vector<32x128xi1>, vector<32x128xf32>
    %c0_11 = arith.constant 0 : index
    %c0_12 = arith.constant 0 : index
    %20 = vector.load %arg5[%c0_11, %c0_12] : memref<4x32xf32, #tpu.memory_space<vmem>>, vector<4x32xf32>
    %cst_13 = arith.constant dense<0.000000e+00> : vector<4x128xf32>
    %21 = tpu.matmul %20, %19, %cst_13 {dimension_numbers = #tpu.dot_dimension_numbers<[1], [0], [0], [1], [0, 0, 1, 1], [], []>} : vector<4x32xf32>, vector<32x128xf32>, vector<4x128xf32> -> vector<4x128xf32>
    %c0_14 = arith.constant 0 : index
    %c0_15 = arith.constant 0 : index
    %22 = vector.load %arg6[%c0_14, %c0_15] : memref<4x1xf32, #tpu.memory_space<vmem>>, vector<4x1xf32>
    %23 = vector.broadcast %22 : vector<4x1xf32> to vector<4x128xf32>
    %24 = arith.addf %21, %23 : vector<4x128xf32>
    %c0_16 = arith.constant 0 : index
    %c0_17 = arith.constant 0 : index
    %25 = vector.load %arg7[%c0_16, %c0_17] : memref<4x128xf32, #tpu.memory_space<vmem>>, vector<4x128xf32>
    tpu.vector_store %arg7[%c0_16, %c0_17], %24 {strides = array<i32>} : memref<4x128xf32, #tpu.memory_space<vmem>>, vector<4x128xf32>,
    return
  }
  func.func @transform_0(%arg0: i32) -> (i32, i32) {
    %c0_i32 = arith.constant 0 : i32
    %c0_i32_0 = arith.constant 0 : i32
    return %c0_i32, %arg0 : i32, i32
  }
  func.func @transform_1(%arg0: i32) -> (i32, i32) {
    %c0_i32 = arith.constant 0 : i32
    %c0_i32_0 = arith.constant 0 : i32
    %c0_i32_1 = arith.constant 0 : i32
    return %c0_i32, %c0_i32_0 : i32, i32
  }
  func.func @transform_2(%arg0: i32) -> (i32, i32) {
    %c0_i32 = arith.constant 0 : i32
    %c0_i32_0 = arith.constant 0 : i32
    %c0_i32_1 = arith.constant 0 : i32
    return %c0_i32, %c0_i32_0 : i32, i32
  }
  func.func @transform_3(%arg0: i32) -> (i32, i32) {
    %c0_i32 = arith.constant 0 : i32
    %c0_i32_0 = arith.constant 0 : i32
    %c0_i32_1 = arith.constant 0 : i32
    return %c0_i32, %c0_i32_0 : i32, i32
  }
  func.func @transform_4(%arg0: i32) -> (i32, i32) {
    %c0_i32 = arith.constant 0 : i32
    %c0_i32_0 = arith.constant 0 : i32
    %c0_i32_1 = arith.constant 0 : i32
    return %c0_i32, %c0_i32_0 : i32, i32
  }
  func.func @transform_5(%arg0: i32) -> (i32, i32) {
    %c0_i32 = arith.constant 0 : i32
    %c0_i32_0 = arith.constant 0 : i32
    %c0_i32_1 = arith.constant 0 : i32
    return %c0_i32, %c0_i32_0 : i32, i32
  }
  func.func @transform_6(%arg0: i32) -> (i32, i32) {
    %c0_i32 = arith.constant 0 : i32
    %c0_i32_0 = arith.constant 0 : i32
    return %c0_i32, %arg0 : i32, i32
  }
}

</mosaic_0001>

<bundles_post_ra>
// kernel: tpu_custom_call.1
= control target key start
LH: loop header
LB: loop body
LE: loop exit
PB: predicated region body
PF: predicated region fallthrough
CT: control target
= control target key end

     0   :  { %vm50_vm0 = vcmask 97280   ;;  %s739_s0 = inlined_call_operand.vmem [shape: f32[12,128], index: 0, kind: input, shape index: {}]   ;;  %s740_s1 = inlined_call_operand.vmem [shape: f32[64,12], index: 1, kind: input, shape index: {}]   ;;  %s741_s2 = inlined_call_operand.vmem [shape: f32[32,64], index: 2, kind: input, shape index: {}]   ;;  %s742_s3 = inlined_call_operand.vmem [shape: f32[32,1], index: 3, kind: input, shape index: {}]   ;;  %s743_s4 = inlined_call_operand.vmem [shape: f32[4,32], index: 4, kind: input, shape index: {}]   ;;  %s744_s5 = inlined_call_operand.vmem [shape: f32[4,1], index: 5, kind: input, shape index: {}]   ;;  %s745_s6 = inlined_call_operand.hbm [shape: f32[4,128], index: 6, kind: output, shape index: {}]  }
   0x1   :  { %v24_v0 = vld [vmem:[%s739_s0] sm:$0xff]  ;;  %v25_v1 = vld [vmem:[%s739_s0 + $0x8] sm:$0xf] }
   0x2   :  { %v42_v2 = vld [vmem:[%s740_s1] sm:$0xff]  ;;  %v434_v3 = vmul.f32 -1.442695, %v24_v0  ;;  %v435_v4 = vmul.f32 -1.442695, %v25_v1 }
   0x3   :  { %481 = vmatprep.mubr.msk.f32.mxu0 %vm50_vm0, %v42_v2 }
   0x4   :  { %562 = vpow2.f32 %v434_v3 }
   0x5   :  { %564 = vpow2.f32 %v435_v4 }
   0x6   :  { %11 = vsyncpa [#allocation3], 0  ;;  %vm75_vm1 = vcmask 1043456   ;;  %vm614_vm2 = vmmov 1   ;;  %v43_v16 = vld [vmem:[%s740_s1 + $0x8] sm:$0xff]  ;;  %v44_v17 = vld [vmem:[%s740_s1 + $0x10] sm:$0xff] }
   0x7   :  { %vm527_vm3 = vmpackc.low %vm75_vm1, %vm614_vm2  ;;  %v45_v18 = vld [vmem:[%s740_s1 + $0x18] sm:$0xff]  ;;  %v46_v19 = vld [vmem:[%s740_s1 + $0x20] sm:$0xff]  ;;  %vm228_vm4 = vcmask 523264   ;;  %v615_v25 = vmov 0   ;;  %v616_v61 = vmov 0.0|0.0   ;;  %vm617_vm5 = vmmov 0  }
   0x8   :  { %v47_v20 = vld [vmem:[%s740_s1 + $0x28] sm:$0xff]  ;;  %v48_v21 = vld [vmem:[%s740_s1 + $0x30] sm:$0xff]  ;;  %v49_v22 = vld [vmem:[%s740_s1 + $0x38] sm:$0xff]  ;;  %560 = vset.pattern.permute.xlu0 %v615_v25  ;;  %561 = vset.pattern.permute.xlu1 %v615_v25  ;;  %v618_v62 = vmov 0.0   ;;  %vm345_vm10 = vcmask 261120   ;;  %s619_s7 = smov [#allocation2]  }
   0x9   :  { %v200_v23 = vld [vmem:[%s741_s2] sm:$0xff]  ;;  %v206_v26 = vld [vmem:[%s742_s3 + $0x10] sm:$0xff]  ;;  %v205_v27 = vld [vmem:[%s742_s3 + $0x8] sm:$0xff]  ;;  %s426_s8 = sshll.u32 %s619_s7, 4  ;;  %s427_s8 = int_to_ptr.vmem [resolvable:$true] %s426_s8 }
   0xa   :  { %509 = vmatprep.mubr.msk.f32.mxu1 %vm228_vm4, %v200_v23  ;;  %v204_v24 = vld [vmem:[%s742_s3] sm:$0xff]  ;;  %220 = vperm.xlu1 %561, %v206_v26   ;;  %v207_v28 = vld [vmem:[%s742_s3 + $0x18] sm:$0xff]  ;;  %v201_v58 = vld [vmem:[%s741_s2 + $0x8] sm:$0xff]  ;;  %s590_s9 = scalar_lea.vmem %s427_s8, 64  ;;  %p595_p1 = scmp.lt.s32.totalorder %s427_s8, %s427_s8 }
   0xb   :  { %210 = vperm.xlu0 %560, %v204_v24   ;;  %v339_v29 = vld [vmem:[%s744_s5] sm:$0xf]  ;;  %v202_v59 = vld [vmem:[%s741_s2 + $0x10] sm:$0xff]  ;;  %v203_v60 = vld [vmem:[%s741_s2 + $0x18] sm:$0xff]  ;;  %p591_p0 = scmp.ne.s32.totalorder %s427_s8, %s590_s9  ;;  %p596_p2 = scmp.lt.s32.totalorder %s590_s9, %s590_s9 }
   0xd   :  { %p597_p3 = por %p596_p2, %p595_p1 }
   0xe   :  { %v563_v5 = vpop.eup %562  ;;  %225 = vperm.xlu1 %561, %v207_v28  }
   0xf   :  { %v565_v6 = vpop.eup %564  ;;  %v32_v7 = vadd.f32 1.0, %v563_v5  ;;  %215 = vperm.xlu0 %560, %v205_v27   ;;  %p598_p4 = pnand %p597_p3, %p591_p0 }
  0x10   :  { %v33_v8 = vadd.f32 1.0, %v565_v6 }
  0x11   :  { %566 = vrcp.f32 %v32_v7 }
  0x12   :  { %568 = vrcp.f32 %v33_v8 }
  0x13   :  { %342 = vperm.xlu0 %560, %v339_v29  }
  0x1b   :  { %v567_v9 = vpop.eup %566 }
  0x1c   :  { %v569_v10 = vpop.eup %568  ;;  %570 = vlog2.f32 %v567_v9 }
  0x1d   :  { %572 = vlog2.f32 %v569_v10 }
  0x26   :  { %v571_v11 = vpop.eup %570 }
  0x27   :  { %v573_v12 = vpop.eup %572  ;;  %v39_v13 = vmul.f32 0.6931472, %v571_v11 }
  0x28   :  { %v41_v14 = vmul.f32 0.6931472, %v573_v12 }
  0x2a   :  { %v526_v15 = vpack.c.bf16 %v41_v14, %v39_v13 }
  0x2c   :  { %528 = vmatprep.subr.msk.bf16.mxu0 %vm527_vm3, %v526_v15 }
  0x2d   :  { %531 = vmatpush3.bf16.msk.msra.mxu0 %vm527_vm3, %v526_v15 }
  0x2e   :  { %548 = vmatprep.subr.bf16.mxu0 %v616_v61 }
  0x30   :  { %482 = vmatmul.mubr.msk.f32.vlgmr.msra.gmra.mrb[0].mxu0 %vm50_vm0, %v43_v16 }
  0x31   :  { %484 = vmatprep.mubr.msk.f32.mxu0 %vm50_vm0, %v44_v17 }
  0x34   :  { %485 = vmatmul.mubr.msk.f32.gmra.mrb[2].mxu0 %vm50_vm0, %v45_v18 }
  0x35   :  { %487 = vmatprep.mubr.msk.f32.mxu0 %vm50_vm0, %v46_v19 }
  0x38   :  { %488 = vmatmul.mubr.msk.f32.gmra.mrb[4].mxu0 %vm50_vm0, %v47_v20 }
  0x39   :  { %490 = vmatprep.mubr.msk.f32.mxu0 %vm50_vm0, %v48_v21  ;;  %v338_v21 = vld [vmem:[%s743_s4] sm:$0xf] }
  0x3c   :  { %491 = vmatmul.mubr.msk.f32.gmra.mrb[6].mxu0 %vm50_vm0, %v49_v22 }
  0x3d   :  { %523 = vmatprep.mubr.msk.f32.mxu0 %vm617_vm5, %v618_v62 }
  0x89   :  { %v221_v0 = vpop.permute.xlu1 %220 }
  0x8a   :  { %v211_v63 = vpop.permute.xlu0 %210 }
  0x8d   :  { %v226_v8 = vpop.permute.xlu1 %225 }
  0x8e   :  { %v216_v1 = vpop.permute.xlu0 %215 }
  0x92   :  { %v343_v22 = vpop.permute.xlu0 %342 }
 0x103   :  { %v483_v30 = vpop.f32.mrb[0].mxu0 }
 0x104   :  { %v186_v31 = vmul.f32 1.442695, %v483_v30  ;;  %v145_v32 = vpop.f32.mrb[1].mxu0 }
 0x105   :  { %v184_v33 = vmul.f32 1.442695, %v145_v32 }
 0x106   :  { %574 = vpow2.f32 %v186_v31 }
 0x107   :  { %576 = vpow2.f32 %v184_v33  ;;  %v486_v34 = vpop.f32.mrb[2].mxu0 }
 0x108   :  { %v190_v35 = vmul.f32 1.442695, %v486_v34  ;;  %v155_v36 = vpop.f32.mrb[3].mxu0 }
 0x109   :  { %v188_v37 = vmul.f32 1.442695, %v155_v36 }
 0x10a   :  { %578 = vpow2.f32 %v190_v35 }
 0x10b   :  { %580 = vpow2.f32 %v188_v37  ;;  %v489_v38 = vpop.f32.mrb[4].mxu0 }
 0x10c   :  { %v194_v39 = vmul.f32 1.442695, %v489_v38  ;;  %v165_v40 = vpop.f32.mrb[5].mxu0 }
 0x10d   :  { %v192_v41 = vmul.f32 1.442695, %v165_v40 }
 0x10e   :  { %582 = vpow2.f32 %v194_v39 }
 0x10f   :  { %584 = vpow2.f32 %v192_v41  ;;  %v492_v42 = vpop.f32.mrb[6].mxu0 }
 0x110   :  { %v575_v43 = vpop.eup %574  ;;  %v198_v44 = vmul.f32 1.442695, %v492_v42  ;;  %v175_v45 = vpop.f32.mrb[7].mxu0 }
 0x111   :  { %v577_v46 = vpop.eup %576  ;;  %v196_v47 = vmul.f32 1.442695, %v175_v45 }
 0x112   :  { %586 = vpow2.f32 %v198_v44  ;;  %v532_v48 = vpack.c.bf16 %v575_v43, %v577_v46 }
 0x113   :  { %588 = vpow2.f32 %v196_v47 }
 0x114   :  { %v579_v49 = vpop.eup %578  ;;  %533 = vmatprep.subr.bf16.mxu1 %v532_v48 }
 0x115   :  { %v581_v50 = vpop.eup %580  ;;  %535 = vmatpush3.bf16.msra.mxu1 %v532_v48 }
 0x116   :  { %v536_v51 = vpack.c.bf16 %v579_v49, %v581_v50 }
 0x118   :  { %v583_v52 = vpop.eup %582  ;;  %537 = vmatprep.subr.bf16.mxu1 %v536_v51 }
 0x119   :  { %v585_v53 = vpop.eup %584  ;;  %539 = vmatpush3.bf16.msra.mxu1 %v536_v51 }
 0x11a   :  { %v540_v54 = vpack.c.bf16 %v583_v52, %v585_v53 }
 0x11c   :  { %v587_v55 = vpop.eup %586  ;;  %541 = vmatprep.subr.bf16.mxu1 %v540_v54 }
 0x11d   :  { %v589_v56 = vpop.eup %588  ;;  %543 = vmatpush3.bf16.msra.mxu1 %v540_v54 }
 0x11e   :  { %v544_v57 = vpack.c.bf16 %v587_v55, %v589_v56 }
 0x120   :  { %545 = vmatprep.subr.bf16.mxu1 %v544_v57 }
 0x121   :  { %547 = vmatpush3.bf16.msra.mxu1 %v544_v57 }
 0x124   :  { %510 = vmatmul.mubr.msk.f32.vlgmr.msra.gmra.mrb[0].mxu1 %vm228_vm4, %v201_v58 }
 0x125   :  { %512 = vmatprep.mubr.msk.f32.mxu1 %vm228_vm4, %v202_v59 }
 0x128   :  { %513 = vmatmul.mubr.msk.f32.gmra.mrb[2].mxu1 %vm228_vm4, %v203_v60 }
 0x1f7   :  { %v511_v2 = vpop.f32.mrb[0].mxu1 }
 0x1f8   :  { %v313_v3 = vadd.f32 %v511_v2, %v216_v1  ;;  %v307_v4 = vpop.f32.mrb[1].mxu1 }
 0x1f9   :  { %v308_v5 = vadd.f32 %v307_v4, %v211_v63 }
 0x1fa   :  { %vm327_vm6 = vcmp.gt.f32.partialorder %v313_v3, 0.0  ;;  %v331_v6 = vmul.f32 0.25, %v313_v3 }
 0x1fb   :  { %vm326_vm7 = vcmp.gt.f32.partialorder %v308_v5, 0.0  ;;  %v330_v7 = vmul.f32 0.25, %v308_v5  ;;  %v514_v9 = vpop.f32.mrb[2].mxu1 }
 0x1fc   :  { %v335_v10 = vsel %vm327_vm6, %v313_v3, %v331_v6  ;;  %v323_v11 = vadd.f32 %v514_v9, %v226_v8  ;;  %v317_v12 = vpop.f32.mrb[3].mxu1 }
 0x1fd   :  { %v334_v13 = vsel %vm326_vm7, %v308_v5, %v330_v7  ;;  %v318_v14 = vadd.f32 %v317_v12, %v221_v0 }
 0x1fe   :  { %v549_v15 = vpack.c.bf16 %v335_v10, %v334_v13  ;;  %vm329_vm8 = vcmp.gt.f32.partialorder %v323_v11, 0.0  ;;  %v333_v16 = vmul.f32 0.25, %v323_v11 }
 0x1ff   :  { %vm328_vm9 = vcmp.gt.f32.partialorder %v318_v14, 0.0  ;;  %v332_v17 = vmul.f32 0.25, %v318_v14 }
 0x200   :  { %v337_v18 = vsel %vm329_vm8, %v323_v11, %v333_v16  ;;  %550 = vmatpush3.bf16.msra.mxu0 %v549_v15 }
 0x201   :  { %v336_v19 = vsel %vm328_vm9, %v318_v14, %v332_v17  ;;  %551 = vmatprep.subr.bf16.mxu0 %v616_v61 }
 0x202   :  { %v552_v20 = vpack.c.bf16 %v337_v18, %v336_v19 }
 0x204   :  { %553 = vmatpush3.bf16.msra.mxu0 %v552_v20 }
 0x207   :  { %524 = vmatmul.mubr.msk.f32.vlgmr.msra.gmra.mrb[8].mxu0 %vm345_vm10, %v338_v21 }
 0x2da   :  { %v415_v23 = vpop.f32.mrb[8].mxu0 }
 0x2db   :  { %v416_v24 = vadd.f32 %v415_v23, %v343_v22  ;;  %v525_v25 = vpop.f32.mrb[9].mxu0 }
 0x2dd   :  { %419 = vst [vmem:[#allocation2] sm:$0xf] %v416_v24 }
 0x2de   :  { %601 = shalt.err (!%p598_p4)
}
 0x2df   :  { %s602_s4 = scalar_lea.hbm %s745_s6, 64 }
 0x2e0   :  { %p603_p5 = scmp.ne.s32.totalorder %s745_s6, %s602_s4  ;;  %p606_p6 = scmp.lt.u32.totalorder %s602_s4, %s745_s6 }
 0x2e2   :  { %p608_p7 = pnand %p606_p6, %p603_p5 }
 0x2e4   :  { %611 = shalt.err (!%p608_p7)
}
 0x2e5   :  { %429 = dma.vmem_to_hbm [thread:$0]  %s427_s8, 64, %s745_s6, [#allocation3]  }
 0x2e6   :  { %612 = dma.done.wait [#allocation3], 64  }
 0x2e7   :  { %613 = vsyncadd [#allocation3], 4294967232 }
 0x2e8   :  { %433 = vsyncpa [#allocation3], 1 }

</bundles_post_ra>
